<compile_context>
chip_gen: v5e
topology: v5e:2x2
jax: 0.10.0
libtpu: 0.0.40
codegen_flags: <defaults>
</compile_context>

<pallas_src>
from math import sqrt

import jax
import jax.numpy as jnp
from jax.experimental import pallas as pl
from jax.experimental.pallas import tpu as pltpu


def _round_up(x, m):
    return ((x + m - 1) // m) * m


# ----------------------------------------------------------------------------
# Pallas kernel: one (token tile, vocab tile) grid step
# ----------------------------------------------------------------------------
def _embedding_kernel(idx_ref, table_ref, out_ref, acc_ref):
    # idx_ref   : (TN, 1)  int32   token indices for this token tile
    # table_ref : (Vt, D)  float32 one vocab tile of the embedding table
    # out_ref   : (TN, D)  float32 output tile (same block across the vocab axis)
    # acc_ref   : (TN, D)  float32 VMEM accumulator scratch
    k = pl.program_id(1)

    @pl.when(k == 0)
    def _init():
        acc_ref[...] = jnp.zeros_like(acc_ref)

    tn = idx_ref.shape[0]
    v_tile = table_ref.shape[0]
    v_base = k * v_tile  # element offset of this vocab tile

    idx = idx_ref[...]                                                 # (TN, 1)
    vocab_iota = jax.lax.broadcasted_iota(jnp.int32, (tn, v_tile), 1) + v_base
    one_hot = (idx == vocab_iota).astype(table_ref.dtype)              # (TN, Vt)

    acc_ref[...] += jnp.dot(
        one_hot, table_ref[...], preferred_element_type=jnp.float32
    )

    @pl.when(k == pl.num_programs(1) - 1)
    def _finalize():
        out_ref[...] = acc_ref[...].astype(out_ref.dtype)


# ----------------------------------------------------------------------------
# Tile selection + pallas_call wrapper
# ----------------------------------------------------------------------------
_VMEM_BUDGET_BYTES = 40 * 1024 * 1024   # conservative: leaves headroom on v7x (64 MiB)
_VMEM_LIMIT_BYTES = 48 * 1024 * 1024    # explicit scoped-VMEM limit (< 64 MiB on v7x)
_SMALL_TABLE_BYTES = 4 * 1024 * 1024    # below this, keep the whole table per step
_VOCAB_TILE = 512                       # multiple of 128 (v5e) and 256 (v6e/v7x)
_MAX_TOKEN_TILE = 512


def _choose_tiles(n_tokens, vocab, dim):
    """Pick (token_tile, v_tile) so double-buffered tiles fit the VMEM budget."""
    table_bytes = vocab * dim * 4
    v_tile = vocab if table_bytes <= _SMALL_TABLE_BYTES else _VOCAB_TILE

    def vmem_bytes(tt):
        idx_b = 2 * tt * 4             # double-buffered index tile
        tab_b = 2 * v_tile * dim * 4   # double-buffered table tile
        out_b = 2 * tt * dim * 4       # double-buffered output tile
        acc_b = tt * dim * 4           # accumulator scratch
        return idx_b + tab_b + out_b + acc_b

    token_tile = min(_MAX_TOKEN_TILE, _round_up(max(n_tokens, 1), 8))
    while token_tile > 8 and vmem_bytes(token_tile) > _VMEM_BUDGET_BYTES:
        token_tile = _round_up(token_tile // 2, 8)
    return token_tile, v_tile


def _embedding_lookup(idx_2d, table, *, token_tile, v_tile):
    """idx_2d: (N_pad, 1) int32, table: (V_pad, D) f32 -> (N_pad, D) f32."""
    n_pad = idx_2d.shape[0]
    v_pad, d = table.shape
    grid = (n_pad // token_tile, v_pad // v_tile)

    return pl.pallas_call(
        _embedding_kernel,
        out_shape=jax.ShapeDtypeStruct((n_pad, d), table.dtype),
        grid_spec=pltpu.PrefetchScalarGridSpec(
            num_scalar_prefetch=0,
            grid=grid,
            in_specs=[
                pl.BlockSpec((token_tile, 1), lambda i, k: (i, 0)),
                pl.BlockSpec((v_tile, d), lambda i, k: (k, 0)),
            ],
            out_specs=pl.BlockSpec((token_tile, d), lambda i, k: (i, 0)),
            scratch_shapes=[pltpu.VMEM((token_tile, d), jnp.float32)],
        ),
        compiler_params=pltpu.CompilerParams(
            dimension_semantics=("parallel", "arbitrary"),
            vmem_limit_bytes=_VMEM_LIMIT_BYTES,
        ),
    )(idx_2d, table)


# ----------------------------------------------------------------------------
# Module-equivalent wrapper
# ----------------------------------------------------------------------------
class MultilingualEmbedding:
    def __init__(self, lang_id2symbols, dim, padding_idx=0, seed=0):
        self.lang_id2symbols = lang_id2symbols
        self.dim = dim
        self.padding_idx = padding_idx
        self.tables = {}  # insertion order preserved, like nn.ParameterDict

        key = jax.random.PRNGKey(seed)
        for lang_id, v in lang_id2symbols.items():
            if len(v) > 0:
                key, sub = jax.random.split(key)
                n = len(v)
                std = sqrt(2.0 / (n + dim))
                val = sqrt(3.0) * std
                w = jax.random.uniform(
                    sub, (n, dim), dtype=jnp.float32, minval=-val, maxval=val
                )
                w = w.at[padding_idx].set(0.0)
                self.tables[f"table-{lang_id}"] = w

        # Cache the concatenated table once (lang_id == '' path); rebuilding it
        # on every forward is a full HBM rewrite of the whole table.
        self._concat_table = (
            jnp.concatenate(list(self.tables.values()), axis=0)
            if self.tables else None
        )

    def __call__(self, x, lang_id=""):
        if lang_id == "":
            table = self._concat_table
        else:
            table = self.tables[f"table-{lang_id}"]

        orig_shape = x.shape
        idx = x.reshape(-1).astype(jnp.int32)
        n = idx.shape[0]
        v, d = table.shape

        token_tile, v_tile = _choose_tiles(n, v, d)

        # pad tokens with padding_idx (row is all zeros anyway), sliced off below
        n_pad = _round_up(n, token_tile)
        idx = jnp.pad(idx, (0, n_pad - n), constant_values=self.padding_idx)
        idx_2d = idx[:, None]  # (N_pad, 1)

        # pad the vocab dim to a multiple of the vocab tile (only for large,
        # tiled tables); padded rows are never selected, zeros are harmless
        if v % v_tile != 0:
            table = jnp.pad(table, ((0, _round_up(v, v_tile) - v), (0, 0)))

        out = _embedding_lookup(idx_2d, table, token_tile=token_tile, v_tile=v_tile)
        return out[:n].reshape(*orig_shape, self.dim)


# ----------------------------------------------------------------------------
# Demo / check
# ----------------------------------------------------------------------------
if __name__ == "__main__":
    lang_id2symbols = {
        "en": list(range(40)),
        "zh": list(range(48)),
        "empty": [],  # exercises the "len(v) == 0 -> no table" branch
    }
    dim = 32
    module = MultilingualEmbedding(lang_id2symbols, dim, padding_idx=0, seed=0)

    key = jax.random.PRNGKey(0)
    k1, k2 = jax.random.split(key)

    batch, seq = 2, 8
    concat_vocab = 40 + 48
    # indices for the concatenated-table path (lang_id='')
    x_all = jax.random.randint(k1, (batch, seq), 0, concat_vocab, dtype=jnp.int32)
    # indices for a single-language path
    x_en = jax.random.randint(k2, (batch, seq), 0, 40, dtype=jnp.int32)

    out_all = module(x_all, lang_id="")
    out_en = module(x_en, lang_id="en")
    jax.block_until_ready((out_all, out_en))

    # reference check in plain JAX
    concat_table = jnp.concatenate(list(module.tables.values()), axis=0)
    ref_all = jnp.take(concat_table, x_all, axis=0)
    ref_en = jnp.take(module.tables["table-en"], x_en, axis=0)

    assert out_all.shape == (batch, seq, dim)
    assert out_en.shape == (batch, seq, dim)
    assert jnp.allclose(out_all, ref_all, atol=1e-6)
    assert jnp.allclose(out_en, ref_en, atol=1e-6)

    print("KERNEL_OK")
</pallas_src>

<mosaic_0001>
module attributes {stable_mosaic.version = 11 : i64} {
  func.func @_embedding_kernel(%arg0: i32, %arg1: i32, %arg2: memref<16x1xi32, #tpu.memory_space<vmem>>, %arg3: memref<88x32xf32, #tpu.memory_space<vmem>>, %arg4: memref<16x32xf32, #tpu.memory_space<vmem>>, %arg5: memref<16x32xf32, #tpu.memory_space<vmem>>) attributes {dimension_semantics = [#tpu.dimension_semantics<parallel>, #tpu.dimension_semantics<arbitrary>], iteration_bounds = array<i64: 1, 1>, scalar_prefetch = 0 : i64, scratch_operands = 1 : i64, tpu.core_type = #tpu.core_type<tc>, window_params = [{transform_indices = @transform_0, window_bounds = array<i64: 16, 1>}, {transform_indices = @transform_1, window_bounds = array<i64: 88, 32>}, {transform_indices = @transform_2, window_bounds = array<i64: 16, 32>}]} {
    %c0_i32 = arith.constant 0 : i32
    %0 = arith.cmpi eq, %arg1, %c0_i32 : i32
    %1 = arith.extui %0 : i1 to i32
    %c0_i32_0 = arith.constant 0 : i32
    %2 = arith.cmpi ne, %1, %c0_i32_0 : i32
    scf.if %2 {
      %cst_10 = arith.constant 0.000000e+00 : f32
      %20 = vector.broadcast %cst_10 : f32 to vector<16x32xf32>
      %c0_11 = arith.constant 0 : index
      %c0_12 = arith.constant 0 : index
      %21 = vector.load %arg5[%c0_11, %c0_12] : memref<16x32xf32, #tpu.memory_space<vmem>>, vector<16x32xf32>
      tpu.vector_store %arg5[%c0_11, %c0_12], %20 {strides = array<i32>} : memref<16x32xf32, #tpu.memory_space<vmem>>, vector<16x32xf32>,
    } else {
    }
    %c88_i32 = arith.constant 88 : i32
    %3 = arith.muli %arg1, %c88_i32 : i32
    %c0 = arith.constant 0 : index
    %c0_1 = arith.constant 0 : index
    %4 = vector.load %arg2[%c0, %c0_1] : memref<16x1xi32, #tpu.memory_space<vmem>>, vector<16x1xi32>
    %5 = tpu.iota {dimensions = array<i32: 1>} : vector<16x88xi32>
    %6 = vector.broadcast %3 : i32 to vector<16x88xi32>
    %7 = arith.addi %5, %6 : vector<16x88xi32>
    %8 = vector.broadcast %4 : vector<16x1xi32> to vector<16x88xi32>
    %9 = arith.cmpi eq, %8, %7 : vector<16x88xi32>
    %10 = arith.extui %9 : vector<16x88xi1> to vector<16x88xi32>
    %11 = arith.sitofp %10 : vector<16x88xi32> to vector<16x88xf32>
    %c0_2 = arith.constant 0 : index
    %c0_3 = arith.constant 0 : index
    %12 = vector.load %arg5[%c0_2, %c0_3] : memref<16x32xf32, #tpu.memory_space<vmem>>, vector<16x32xf32>
    %c0_4 = arith.constant 0 : index
    %c0_5 = arith.constant 0 : index
    %13 = vector.load %arg3[%c0_4, %c0_5] : memref<88x32xf32, #tpu.memory_space<vmem>>, vector<88x32xf32>
    %cst = arith.constant dense<0.000000e+00> : vector<16x32xf32>
    %14 = tpu.matmul %11, %13, %cst {dimension_numbers = #tpu.dot_dimension_numbers<[1], [0], [0], [1], [0, 0, 1, 1], [], []>} : vector<16x88xf32>, vector<88x32xf32>, vector<16x32xf32> -> vector<16x32xf32>
    %15 = arith.addf %12, %14 : vector<16x32xf32>
    %c0_6 = arith.constant 0 : index
    %c0_7 = arith.constant 0 : index
    %16 = vector.load %arg5[%c0_6, %c0_7] : memref<16x32xf32, #tpu.memory_space<vmem>>, vector<16x32xf32>
    tpu.vector_store %arg5[%c0_6, %c0_7], %15 {strides = array<i32>} : memref<16x32xf32, #tpu.memory_space<vmem>>, vector<16x32xf32>,
    %c0_i32_8 = arith.constant 0 : i32
    %17 = arith.cmpi eq, %arg1, %c0_i32_8 : i32
    %18 = arith.extui %17 : i1 to i32
    %c0_i32_9 = arith.constant 0 : i32
    %19 = arith.cmpi ne, %18, %c0_i32_9 : i32
    scf.if %19 {
      %c0_10 = arith.constant 0 : index
      %c0_11 = arith.constant 0 : index
      %20 = vector.load %arg5[%c0_10, %c0_11] : memref<16x32xf32, #tpu.memory_space<vmem>>, vector<16x32xf32>
      %c0_12 = arith.constant 0 : index
      %c0_13 = arith.constant 0 : index
      %21 = vector.load %arg4[%c0_12, %c0_13] : memref<16x32xf32, #tpu.memory_space<vmem>>, vector<16x32xf32>
      tpu.vector_store %arg4[%c0_12, %c0_13], %20 {strides = array<i32>} : memref<16x32xf32, #tpu.memory_space<vmem>>, vector<16x32xf32>,
    } else {
    }
    return
  }
  func.func @transform_0(%arg0: i32, %arg1: i32) -> (i32, i32) {
    %c0_i32 = arith.constant 0 : i32
    %c0_i32_0 = arith.constant 0 : i32
    return %arg0, %c0_i32 : i32, i32
  }
  func.func @transform_1(%arg0: i32, %arg1: i32) -> (i32, i32) {
    %c0_i32 = arith.constant 0 : i32
    %c0_i32_0 = arith.constant 0 : i32
    return %arg1, %c0_i32 : i32, i32
  }
  func.func @transform_2(%arg0: i32, %arg1: i32) -> (i32, i32) {
    %c0_i32 = arith.constant 0 : i32
    %c0_i32_0 = arith.constant 0 : i32
    return %arg0, %c0_i32 : i32, i32
  }
}

</mosaic_0001>

<bundles_post_ra>
// kernel: tpu_custom_call.1
= control target key start
LH: loop header
LB: loop body
LE: loop exit
PB: predicated region body
PF: predicated region fallthrough
CT: control target
= control target key end

     0   :  { %v158_v2 = vmov 0   ;;  %s226_s0 = inlined_call_operand.vmem [shape: s32[16,1], index: 0, kind: input, shape index: {}]   ;;  %s227_s1 = inlined_call_operand.vmem [shape: f32[88,32], index: 1, kind: input, shape index: {}]   ;;  %s228_s2 = inlined_call_operand.hbm [shape: f32[16,32], index: 2, kind: output, shape index: {}]  }
   0x1   :  { %v20_v0 = vld [vmem:[%s226_s0] sm:$0xff]  ;;  %v50_v1 = vld [vmem:[%s227_s1 + $0x50] sm:$0xff]  ;;  %131 = vset.pattern.permute.xlu0 %v158_v2  ;;  %v49_v3 = vld [vmem:[%s227_s1 + $0x48] sm:$0xff] }
   0x2   :  { %63 = vmatpush.msra.mxu0 %v50_v1  ;;  %27 = vperm.xlu0 %131, %v20_v0   ;;  %v48_v4 = vld [vmem:[%s227_s1 + $0x40] sm:$0xff]  ;;  %v47_v5 = vld [vmem:[%s227_s1 + $0x38] sm:$0xff] }
   0x3   :  { %115 = vmatpush.msra.mxu1 %v50_v1 }
   0x4   :  { %64 = vmatpush.msra.mxu0 %v49_v3 }
   0x5   :  { %116 = vmatpush.msra.mxu1 %v49_v3 }
   0x6   :  { %7 = vsyncpa [#allocation4], 0  ;;  %65 = vmatpush.msra.mxu0 %v48_v4  ;;  %v46_v6 = vld [vmem:[%s227_s1 + $0x30] sm:$0xff]  ;;  %v21_v7 = vld [vmem:[%s226_s0 + $0x8] sm:$0xff]  ;;  %vm16_vm0 = vcmask 261120   ;;  %v159_v14 = vmov 0.0   ;;  %v22_v15 = vlaneseq }
   0x7   :  { %117 = vmatpush.msra.mxu1 %v48_v4  ;;  %v45_v8 = vld [vmem:[%s227_s1 + $0x28] sm:$0xff]  ;;  %v44_v9 = vld [vmem:[%s227_s1 + $0x20] sm:$0xff]  ;;  %v43_v10 = vld [vmem:[%s227_s1 + $0x18] sm:$0xff]  ;;  %17 = vst.msk [vmem:[#allocation2] sm:$0xff] %vm16_vm0, %v159_v14  ;;  %vm51_vm1 = vcmask 719872   ;;  %s99_s9 = sshll.u32 %s228_s2, 4  ;;  %s100_s9 = int_to_ptr.hbm [resolvable:$true] %s99_s9 }
   0x8   :  { %66 = vmatpush.msra.mxu0 %v47_v5  ;;  %v42_v11 = vld [vmem:[%s227_s1 + $0x10] sm:$0xff]  ;;  %v41_v12 = vld [vmem:[%s227_s1 + $0x8] sm:$0xff]  ;;  %v40_v13 = vld [vmem:[%s227_s1] sm:$0xff]  ;;  %18 = vst.msk [vmem:[#allocation2 + $0x8] sm:$0xff] %vm16_vm0, %v159_v14  ;;  %v23_v16 = vand.u32 127, %v22_v15  ;;  %s160_s1 = smov [#allocation3]  }
   0x9   :  { %118 = vmatpush.msra.mxu1 %v47_v5  ;;  %s97_s6 = sshll.u32 %s160_s1, 4  ;;  %s161_s10 = smov 128   ;;  %s98_s6 = int_to_ptr.vmem [resolvable:$true] %s97_s6 }
   0xa   :  { %67 = vmatpush.msra.mxu0 %v46_v6  ;;  %30 = vperm.xlu0 %131, %v21_v7   ;;  %s162_s11 = smov 8  }
   0xb   :  { %119 = vmatpush.msra.mxu1 %v46_v6 }
   0xc   :  { %68 = vmatpush.msra.mxu0 %v45_v8 }
   0xd   :  { %120 = vmatpush.msra.mxu1 %v45_v8 }
   0xe   :  { %69 = vmatpush.msra.mxu0 %v44_v9  ;;  %v38_v21 = vld [vmem:[#allocation2] sm:$0xff] }
   0xf   :  { %121 = vmatpush.msra.mxu1 %v44_v9  ;;  %v39_v24 = vld [vmem:[#allocation2 + $0x8] sm:$0xff] }
  0x10   :  { %70 = vmatpush.msra.mxu0 %v43_v10 }
  0x11   :  { %122 = vmatpush.msra.mxu1 %v43_v10 }
  0x12   :  { %71 = vmatpush.msra.mxu0 %v42_v11 }
  0x13   :  { %123 = vmatpush.msra.mxu1 %v42_v11 }
  0x14   :  { %72 = vmatpush.msra.mxu0 %v41_v12 }
  0x15   :  { %124 = vmatpush.msra.mxu1 %v41_v12 }
  0x16   :  { %73 = vmatpush.msra.mxu0 %v40_v13 }
  0x17   :  { %125 = vmatpush.msra.mxu1 %v40_v13 }
  0x74   :  { %v28_v17 = vpop.permute.xlu0 %27 }
  0x75   :  { %vm32_vm2 = vcmp.eq.s32.totalorder %v28_v17, %v23_v16 }
  0x76   :  { %v111_v18 = vsel %vm32_vm2, 1.0, %v159_v14 }
  0x77   :  { %113 = vmatmul.msk.f32.vlgmr.msra.gmra.mxu0 %vm51_vm1, %v111_v18 }
  0x7c   :  { %v31_v19 = vpop.permute.xlu0 %30 }
  0x7d   :  { %vm33_vm3 = vcmp.eq.s32.totalorder %v31_v19, %v23_v16 }
  0x7e   :  { %v112_v20 = vsel %vm33_vm3, 1.0, %v159_v14 }
  0x7f   :  { %114 = vmatmul.msk.f32.vlgmr.msra.gmra.mxu1 %vm51_vm1, %v112_v20 }
  0xf4   :  { %v75_v22 = vpop.f32.mrf.mxu0 }
  0xf5   :  { %v81_v23 = vadd.f32 %v75_v22, %v38_v21 }
  0xf7   :  { %84 = vst.msk [vmem:[#allocation2] sm:$0xff] %vm16_vm0, %v81_v23 }
  0xfc   :  { %v78_v25 = vpop.f32.mrf.mxu1 }
  0xfd   :  { %v82_v26 = vadd.f32 %v78_v25, %v39_v24 }
  0xfe   :  { %v89_v27 = vld [vmem:[#allocation2] sm:$0xff] }
  0xff   :  { %85 = vst.msk [vmem:[#allocation2 + $0x8] sm:$0xff] %vm16_vm0, %v82_v26 }
 0x100   :  { %91 = vst.msk [vmem:[#allocation3] sm:$0xff] %vm16_vm0, %v89_v27 }
 0x106   :  { %v90_v28 = vld [vmem:[#allocation2 + $0x8] sm:$0xff] }
 0x107   :  { %92 = vst.msk [vmem:[#allocation3 + $0x8] sm:$0xff] %vm16_vm0, %v90_v28 }
 0x108   :  { %105 = dma.vmem_to_hbm [thread:$0]  %s98_s6, 256, %s100_s9, [#allocation4], %s161_s10, %s161_s10, %s162_s11  }
 0x109   :  { %156 = dma.done.wait [#allocation4], 256  }
 0x10a   :  { %157 = vsyncadd [#allocation4], 4294967040 }
 0x10b   :  { %110 = vsyncpa [#allocation4], 1 }

</bundles_post_ra>
